<compile_context>
chip_gen: v7x
topology: tpu7x:2x2x1
jax: 0.10.0
libtpu: 0.0.40
codegen_flags: <defaults>
</compile_context>

<pallas_src>
import functools

import jax
import jax.numpy as jnp
from jax import lax
from jax.experimental import pallas as pl
from jax.experimental.pallas import tpu as pltpu

BN_EPS = 1e-5
_LANE = 128
_SUBLANE = 8


def _round_up(v, m):
    return (v + m - 1) // m * m


def _compiler_params(dimension_semantics):
    """CompilerParams with a per-generation VMEM limit when discoverable."""
    kwargs = dict(dimension_semantics=dimension_semantics)
    try:
        cap = getattr(pltpu.get_tpu_info(), "vmem_capacity_bytes", None)
        if cap:
            # ~3/4 of physical VMEM, capped at 100 MiB (v5e/v6e: 128 MiB,
            # v7x: 64 MiB physical).
            kwargs["vmem_limit_bytes"] = int(min(cap * 3 // 4,
                                                 100 * 1024 * 1024))
    except Exception:
        pass
    return pltpu.CompilerParams(**kwargs)


# ---------------------------------------------------------------------------
# Pass 1: per-image partial sums for training-mode BatchNorm statistics.
# Batch axis is "parallel" (each step owns its own output block), so the
# stats pass can be sharded across TensorCores on v7x; the tiny reduction
# over the batch axis happens in the wrapper.
# ---------------------------------------------------------------------------
def bn_stats_kernel(x_ref, sum_ref, sq_ref):
    x = x_ref[0].astype(jnp.float32)                       # (C, HW)
    sum_ref[0] = jnp.sum(x, axis=1, keepdims=True)         # (C, 1)
    sq_ref[0] = jnp.sum(x * x, axis=1, keepdims=True)


# ---------------------------------------------------------------------------
# Pass 2: BN apply + 3x3 LBC conv + ReLU + 1x1 conv + bias + residual.
# One grid step processes one image in a flat (C, H*W) layout (lane-dense
# stores, unpadded HBM traffic).
# ---------------------------------------------------------------------------
def lbc_main_kernel(x_ref, scale_ref, shift_ref, w3_ref, w1_ref, b1_ref,
                    mask_l_ref, mask_r_ref, o_ref, xpad_ref,
                    *, W, HW, halo, compute_dtype):
    f32 = jnp.float32
    C = x_ref.shape[1]                                      # true channels

    x = x_ref[0].astype(f32)                                # (C, HW)

    # ---- BatchNorm apply (global batch stats folded into scale / shift) ----
    xn = x * scale_ref[...] + shift_ref[...]

    # ---- halo-padded flat row buffer --------------------------------------
    # (C_pad, halo | HW | halo); zeros everywhere except the live image rows,
    # so dy = +-1 taps read conv zero-padding at the top / bottom image edge
    # and the channel-pad rows contribute nothing to the matmuls.
    xpad_ref[...] = jnp.zeros(xpad_ref.shape, xpad_ref.dtype)
    xpad_ref[:C, halo:halo + HW] = xn      # lane-aligned (halo % 128 == 0)

    mask_l = mask_l_ref[...]                                # (1, HW) f32
    mask_r = mask_r_ref[...]

    # ---- 3x3 LBC conv: nine lane-shifted (K, C_pad) @ (C_pad, HW) matmuls
    # accumulated in f32 registers -- no im2col patch materialisation.
    h = None
    t = 0
    for dy in (-1, 0, 1):
        for dx in (-1, 0, 1):
            s = dy * W + dx
            tap = xpad_ref[:, halo + s:halo + s + HW]       # (C_pad, HW)
            if dx == -1:
                tap = tap * mask_l                          # column boundary
            elif dx == 1:
                tap = tap * mask_r
            part = jnp.dot(w3_ref[t], tap.astype(compute_dtype),
                           preferred_element_type=f32)      # (K, HW)
            h = part if h is None else h + part
            t += 1
    h = jnp.maximum(h, 0.0)                                 # ReLU

    # ---- 1x1 conv (+ bias) + residual, lane-dense (C, HW) output store ----
    out = jnp.dot(w1_ref[...], h.astype(compute_dtype),
                  preferred_element_type=f32)               # (C_pad, HW)
    out = out + b1_ref[...]
    o_ref[0] = (out[:C, :] + x).astype(o_ref.dtype)


def layer_lbc(x_nchw, gamma, beta, w_lbc, w_1x1, b_1x1,
              *, compute_dtype=jnp.float32):
    """Forward pass of LayerLBC.

    x_nchw : (N, C, H, W) float32     (PyTorch layout)
    gamma, beta : (C,)                BatchNorm affine params
    w_lbc  : (K, C, 3, 3)             fixed ternary weights of ConvLBC
    w_1x1  : (C, K, 1, 1), b_1x1 : (C,)
    returns (N, C, H, W)
    """
    N, C, H, W = x_nchw.shape
    K = w_lbc.shape[0]
    HW = H * W
    C_pad = _round_up(C, _SUBLANE)
    halo = _round_up(W + 1, _LANE)
    f32 = jnp.float32

    # Flat spatial view: free reshape, no materialised pad/slice round trips.
    x3 = x_nchw.reshape(N, C, HW)

    # ---- pass 1: per-image partial sums (parallel batch grid) -------------
    sums, sqs = pl.pallas_call(
        bn_stats_kernel,
        grid=(N,),
        in_specs=(pl.BlockSpec((1, C, HW), lambda n: (n, 0, 0)),),
        out_specs=(pl.BlockSpec((1, C, 1), lambda n: (n, 0, 0)),
                   pl.BlockSpec((1, C, 1), lambda n: (n, 0, 0))),
        out_shape=(jax.ShapeDtypeStruct((N, C, 1), f32),
                   jax.ShapeDtypeStruct((N, C, 1), f32)),
        compiler_params=_compiler_params(("parallel",)),
    )(x3)

    # Tiny (C,)-sized combine: fold batch stats into per-channel scale/shift.
    # NOTE: one-pass var = E[x^2] - mean^2 (clamped at 0); fine at fp32 for
    # the tolerances used here.
    inv_count = 1.0 / float(N * HW)
    mean = jnp.sum(sums, axis=0) * inv_count                # (C, 1)
    var = jnp.maximum(jnp.sum(sqs, axis=0) * inv_count - mean * mean, 0.0)
    scale = gamma.astype(f32).reshape(C, 1) * lax.rsqrt(var + BN_EPS)
    shift = beta.astype(f32).reshape(C, 1) - mean * scale

    # LBC weights -> tap-major (9, K, C_pad); ternary values exact in bf16.
    w3 = jnp.transpose(w_lbc.astype(compute_dtype), (2, 3, 0, 1))  # (3,3,K,C)
    w3 = w3.reshape(9, K, C)
    w3 = jnp.pad(w3, ((0, 0), (0, 0), (0, C_pad - C)))
    # 1x1 conv weights / bias, channel-padded only for the in-kernel matmul.
    w1 = jnp.pad(w_1x1.astype(compute_dtype).reshape(C, K),
                 ((0, C_pad - C), (0, 0)))
    b1 = jnp.pad(b_1x1.astype(f32), (0, C_pad - C)).reshape(C_pad, 1)

    # Column-boundary masks, hoisted out of the kernel (constant index_map:
    # DMA'd once and kept resident across grid steps).
    xi = jnp.arange(HW, dtype=jnp.int32) % W
    mask_l = (xi > 0).astype(f32).reshape(1, HW)            # valid dx = -1
    mask_r = (xi < W - 1).astype(f32).reshape(1, HW)        # valid dx = +1

    # ---- pass 2: fused BN apply + 3x3 LBC + ReLU + 1x1 + residual ---------
    out3 = pl.pallas_call(
        functools.partial(lbc_main_kernel, W=W, HW=HW, halo=halo,
                          compute_dtype=compute_dtype),
        grid=(N,),
        in_specs=(
            pl.BlockSpec((1, C, HW), lambda n: (n, 0, 0)),
            pl.BlockSpec((C, 1), lambda n: (0, 0)),
            pl.BlockSpec((C, 1), lambda n: (0, 0)),
            pl.BlockSpec((9, K, C_pad), lambda n: (0, 0, 0)),
            pl.BlockSpec((C_pad, K), lambda n: (0, 0)),
            pl.BlockSpec((C_pad, 1), lambda n: (0, 0)),
            pl.BlockSpec((1, HW), lambda n: (0, 0)),
            pl.BlockSpec((1, HW), lambda n: (0, 0)),
        ),
        out_specs=pl.BlockSpec((1, C, HW), lambda n: (n, 0, 0)),
        out_shape=jax.ShapeDtypeStruct((N, C, HW), x_nchw.dtype),
        scratch_shapes=[pltpu.VMEM((C_pad, HW + 2 * halo), f32)],
        compiler_params=_compiler_params(("parallel",)),
    )(x3, scale, shift, w3, w1, b1, mask_l, mask_r)

    return out3.reshape(N, C, H, W)


# ---------------------------------------------------------------------------
# Pure-JAX reference (training-mode BatchNorm) for self-validation.
# ---------------------------------------------------------------------------
def layer_lbc_reference(x, gamma, beta, w_lbc, w_1x1, b_1x1):
    mean = jnp.mean(x, axis=(0, 2, 3), keepdims=True)
    var = jnp.mean((x - mean) ** 2, axis=(0, 2, 3), keepdims=True)
    xn = (x - mean) * lax.rsqrt(var + BN_EPS)
    xn = xn * gamma.reshape(1, -1, 1, 1) + beta.reshape(1, -1, 1, 1)
    H, W = x.shape[2], x.shape[3]
    xp = jnp.pad(xn, ((0, 0), (0, 0), (1, 1), (1, 1)))
    h = jnp.zeros((x.shape[0], w_lbc.shape[0], H, W), jnp.float32)
    for i in range(3):
        for j in range(3):
            h = h + jnp.einsum('kc,nchw->nkhw', w_lbc[:, :, i, j],
                               xp[:, :, i:i + H, j:j + W], precision='highest')
    h = jnp.maximum(h, 0.0)
    out = jnp.einsum('ck,nkhw->nchw', w_1x1[:, :, 0, 0], h,
                     precision='highest') + b_1x1.reshape(1, -1, 1, 1)
    return out + x


def init_params(key, num_channels, num_weights, sparsity=0.5):
    """Deterministic parameter init matching the shapes in LayerLBC.__init__."""
    k1, k2, k3, k4 = jax.random.split(key, 4)

    # ConvLBC: fixed ternary weights in {-1, 0, +1}, shape (K, C, 3, 3)
    shape = (num_weights, num_channels, 3, 3)
    binary = jax.random.bernoulli(k1, 0.5, shape).astype(jnp.float32) * 2.0 - 1.0
    inactive = jax.random.uniform(k2, shape) > sparsity
    w_lbc = jnp.where(inactive, 0.0, binary)

    # conv_1x1: PyTorch default uniform init in +-1/sqrt(fan_in)
    bound = 1.0 / (num_weights ** 0.5)
    w_1x1 = jax.random.uniform(k3, (num_channels, num_weights, 1, 1),
                               minval=-bound, maxval=bound).astype(jnp.float32)
    b_1x1 = jax.random.uniform(k4, (num_channels,),
                               minval=-bound, maxval=bound).astype(jnp.float32)

    # BatchNorm2d affine params at init
    gamma = jnp.ones((num_channels,), jnp.float32)
    beta = jnp.zeros((num_channels,), jnp.float32)
    return gamma, beta, w_lbc, w_1x1, b_1x1


if __name__ == "__main__":
    key = jax.random.PRNGKey(0)
    kx, kp = jax.random.split(key)

    N, C, H, W = 2, 4, 16, 16     # batch, numChannels, spatial
    K = 32                        # numWeights

    x = jax.random.normal(kx, (N, C, H, W), jnp.float32)
    gamma, beta, w_lbc, w_1x1, b_1x1 = init_params(kp, C, K, sparsity=0.5)

    out = jax.jit(layer_lbc)(x, gamma, beta, w_lbc, w_1x1, b_1x1)
    out = jax.block_until_ready(out)

    assert out.shape == (N, C, H, W), out.shape
    assert out.dtype == jnp.float32

    ref = layer_lbc_reference(x, gamma, beta, w_lbc, w_1x1, b_1x1)
    max_err = float(jnp.max(jnp.abs(out - ref)))
    # Scale-aware bound: covers potential reduced-precision MXU passes for
    # f32 matmuls while still catching real layout / indexing bugs.
    tol = 5e-2 + 2e-2 * float(jnp.max(jnp.abs(ref)))
    assert max_err < tol, f"max abs error vs reference: {max_err} (tol {tol})"

    print("KERNEL_OK")
</pallas_src>

<mosaic_0001>
module attributes {stable_mosaic.version = 11 : i64} {
  func.func @bn_stats_kernel(%arg0: i32, %arg1: memref<1x4x256xf32, #tpu.memory_space<vmem>>, %arg2: memref<1x4x1xf32, #tpu.memory_space<vmem>>, %arg3: memref<1x4x1xf32, #tpu.memory_space<vmem>>) attributes {dimension_semantics = [#tpu.dimension_semantics<parallel>], iteration_bounds = array<i64: 2>, scalar_prefetch = 0 : i64, scratch_operands = 0 : i64, tpu.core_type = #tpu.core_type<tc>, window_params = [{transform_indices = @transform_0, window_bounds = array<i64: 1, 4, 256>}, {transform_indices = @transform_1, window_bounds = array<i64: 1, 4, 1>}, {transform_indices = @transform_2, window_bounds = array<i64: 1, 4, 1>}]} {
    %c0 = arith.constant 0 : index
    %c0_0 = arith.constant 0 : index
    %c0_1 = arith.constant 0 : index
    %0 = vector.load %arg1[%c0, %c0_0, %c0_1] : memref<1x4x256xf32, #tpu.memory_space<vmem>>, vector<1x4x256xf32>
    %1 = vector.shape_cast %0 : vector<1x4x256xf32> to vector<4x256xf32>
    %cst = arith.constant dense<0.000000e+00> : vector<4xf32>
    %2 = vector.multi_reduction <add>, %1, %cst [1] : vector<4x256xf32> to vector<4xf32>
    %3 = vector.shape_cast %2 : vector<4xf32> to vector<4x1xf32>
    %c0_2 = arith.constant 0 : index
    %c0_3 = arith.constant 0 : index
    %c0_4 = arith.constant 0 : index
    %4 = vector.load %arg2[%c0_2, %c0_3, %c0_4] : memref<1x4x1xf32, #tpu.memory_space<vmem>>, vector<1x4x1xf32>
    %5 = vector.shape_cast %4 : vector<1x4x1xf32> to vector<4x1xf32>
    %6 = vector.shape_cast %3 : vector<4x1xf32> to vector<1x4x1xf32>
    tpu.vector_store %arg2[%c0_2, %c0_3, %c0_4], %6 {strides = array<i32>} : memref<1x4x1xf32, #tpu.memory_space<vmem>>, vector<1x4x1xf32>,
    %7 = arith.mulf %1, %1 : vector<4x256xf32>
    %cst_5 = arith.constant dense<0.000000e+00> : vector<4xf32>
    %8 = vector.multi_reduction <add>, %7, %cst_5 [1] : vector<4x256xf32> to vector<4xf32>
    %9 = vector.shape_cast %8 : vector<4xf32> to vector<4x1xf32>
    %c0_6 = arith.constant 0 : index
    %c0_7 = arith.constant 0 : index
    %c0_8 = arith.constant 0 : index
    %10 = vector.load %arg3[%c0_6, %c0_7, %c0_8] : memref<1x4x1xf32, #tpu.memory_space<vmem>>, vector<1x4x1xf32>
    %11 = vector.shape_cast %10 : vector<1x4x1xf32> to vector<4x1xf32>
    %12 = vector.shape_cast %9 : vector<4x1xf32> to vector<1x4x1xf32>
    tpu.vector_store %arg3[%c0_6, %c0_7, %c0_8], %12 {strides = array<i32>} : memref<1x4x1xf32, #tpu.memory_space<vmem>>, vector<1x4x1xf32>,
    return
  }
  func.func @transform_0(%arg0: i32) -> (i32, i32, i32) {
    %c0_i32 = arith.constant 0 : i32
    %c0_i32_0 = arith.constant 0 : i32
    %c0_i32_1 = arith.constant 0 : i32
    return %arg0, %c0_i32, %c0_i32_0 : i32, i32, i32
  }
  func.func @transform_1(%arg0: i32) -> (i32, i32, i32) {
    %c0_i32 = arith.constant 0 : i32
    %c0_i32_0 = arith.constant 0 : i32
    %c0_i32_1 = arith.constant 0 : i32
    return %arg0, %c0_i32, %c0_i32_0 : i32, i32, i32
  }
  func.func @transform_2(%arg0: i32) -> (i32, i32, i32) {
    %c0_i32 = arith.constant 0 : i32
    %c0_i32_0 = arith.constant 0 : i32
    %c0_i32_1 = arith.constant 0 : i32
    return %arg0, %c0_i32, %c0_i32_0 : i32, i32, i32
  }
}

module attributes {stable_mosaic.version = 11 : i64} {
  func.func @lbc_main_kernel(%arg0: i32, %arg1: memref<1x4x256xf32, #tpu.memory_space<vmem>>, %arg2: memref<4x1xf32, #tpu.memory_space<vmem>>, %arg3: memref<4x1xf32, #tpu.memory_space<vmem>>, %arg4: memref<9x32x8xf32, #tpu.memory_space<vmem>>, %arg5: memref<8x32xf32, #tpu.memory_space<vmem>>, %arg6: memref<8x1xf32, #tpu.memory_space<vmem>>, %arg7: memref<1x256xf32, #tpu.memory_space<vmem>>, %arg8: memref<1x256xf32, #tpu.memory_space<vmem>>, %arg9: memref<1x4x256xf32, #tpu.memory_space<vmem>>, %arg10: memref<8x512xf32, #tpu.memory_space<vmem>>) attributes {dimension_semantics = [#tpu.dimension_semantics<parallel>], iteration_bounds = array<i64: 2>, scalar_prefetch = 0 : i64, scratch_operands = 1 : i64, tpu.core_type = #tpu.core_type<tc>, window_params = [{transform_indices = @transform_0, window_bounds = array<i64: 1, 4, 256>}, {pipeline_mode = #tpu.pipeline_mode<synchronous>, transform_indices = @transform_1, window_bounds = array<i64: 4, 1>}, {pipeline_mode = #tpu.pipeline_mode<synchronous>, transform_indices = @transform_2, window_bounds = array<i64: 4, 1>}, {pipeline_mode = #tpu.pipeline_mode<synchronous>, transform_indices = @transform_3, window_bounds = array<i64: 9, 32, 8>}, {pipeline_mode = #tpu.pipeline_mode<synchronous>, transform_indices = @transform_4, window_bounds = array<i64: 8, 32>}, {pipeline_mode = #tpu.pipeline_mode<synchronous>, transform_indices = @transform_5, window_bounds = array<i64: 8, 1>}, {pipeline_mode = #tpu.pipeline_mode<synchronous>, transform_indices = @transform_6, window_bounds = array<i64: 1, 256>}, {pipeline_mode = #tpu.pipeline_mode<synchronous>, transform_indices = @transform_7, window_bounds = array<i64: 1, 256>}, {transform_indices = @transform_8, window_bounds = array<i64: 1, 4, 256>}]} {
    %c0 = arith.constant 0 : index
    %c0_0 = arith.constant 0 : index
    %c0_1 = arith.constant 0 : index
    %0 = vector.load %arg1[%c0, %c0_0, %c0_1] : memref<1x4x256xf32, #tpu.memory_space<vmem>>, vector<1x4x256xf32>
    %1 = vector.shape_cast %0 : vector<1x4x256xf32> to vector<4x256xf32>
    %c0_2 = arith.constant 0 : index
    %c0_3 = arith.constant 0 : index
    %2 = vector.load %arg2[%c0_2, %c0_3] : memref<4x1xf32, #tpu.memory_space<vmem>>, vector<4x1xf32>
    %3 = vector.broadcast %2 : vector<4x1xf32> to vector<4x256xf32>
    %4 = arith.mulf %1, %3 : vector<4x256xf32>
    %c0_4 = arith.constant 0 : index
    %c0_5 = arith.constant 0 : index
    %5 = vector.load %arg3[%c0_4, %c0_5] : memref<4x1xf32, #tpu.memory_space<vmem>>, vector<4x1xf32>
    %6 = vector.broadcast %5 : vector<4x1xf32> to vector<4x256xf32>
    %7 = arith.addf %4, %6 : vector<4x256xf32>
    %cst = arith.constant 0.000000e+00 : f32
    %8 = vector.broadcast %cst : f32 to vector<8x512xf32>
    %c0_6 = arith.constant 0 : index
    %c0_7 = arith.constant 0 : index
    %9 = vector.load %arg10[%c0_6, %c0_7] : memref<8x512xf32, #tpu.memory_space<vmem>>, vector<8x512xf32>
    tpu.vector_store %arg10[%c0_6, %c0_7], %8 {strides = array<i32>} : memref<8x512xf32, #tpu.memory_space<vmem>>, vector<8x512xf32>,
    %c0_8 = arith.constant 0 : index
    %c128 = arith.constant 128 : index
    %10 = vector.load %arg10[%c0_8, %c128] : memref<8x512xf32, #tpu.memory_space<vmem>>, vector<4x256xf32>
    tpu.vector_store %arg10[%c0_8, %c128], %7 {strides = array<i32>} : memref<8x512xf32, #tpu.memory_space<vmem>>, vector<4x256xf32>,
    %c0_9 = arith.constant 0 : index
    %c0_10 = arith.constant 0 : index
    %11 = vector.load %arg7[%c0_9, %c0_10] : memref<1x256xf32, #tpu.memory_space<vmem>>, vector<1x256xf32>
    %c0_11 = arith.constant 0 : index
    %c0_12 = arith.constant 0 : index
    %12 = vector.load %arg8[%c0_11, %c0_12] : memref<1x256xf32, #tpu.memory_space<vmem>>, vector<1x256xf32>
    %c0_13 = arith.constant 0 : index
    %c111 = arith.constant 111 : index
    %13 = vector.load %arg10[%c0_13, %c111] : memref<8x512xf32, #tpu.memory_space<vmem>>, vector<8x256xf32>
    %14 = vector.broadcast %11 : vector<1x256xf32> to vector<8x256xf32>
    %15 = arith.mulf %13, %14 : vector<8x256xf32>
    %c0_14 = arith.constant 0 : index
    %c0_15 = arith.constant 0 : index
    %c0_16 = arith.constant 0 : index
    %16 = vector.load %arg4[%c0_14, %c0_15, %c0_16] : memref<9x32x8xf32, #tpu.memory_space<vmem>>, vector<1x32x8xf32>
    %17 = vector.shape_cast %16 : vector<1x32x8xf32> to vector<32x8xf32>
    %cst_17 = arith.constant dense<0.000000e+00> : vector<32x256xf32>
    %18 = tpu.matmul %17, %15, %cst_17 {dimension_numbers = #tpu.dot_dimension_numbers<[1], [0], [0], [1], [0, 0, 1, 1], [], []>} : vector<32x8xf32>, vector<8x256xf32>, vector<32x256xf32> -> vector<32x256xf32>
    %c0_18 = arith.constant 0 : index
    %c112 = arith.constant 112 : index
    %19 = vector.load %arg10[%c0_18, %c112] : memref<8x512xf32, #tpu.memory_space<vmem>>, vector<8x256xf32>
    %c1 = arith.constant 1 : index
    %c0_19 = arith.constant 0 : index
    %c0_20 = arith.constant 0 : index
    %20 = vector.load %arg4[%c1, %c0_19, %c0_20] : memref<9x32x8xf32, #tpu.memory_space<vmem>>, vector<1x32x8xf32>
    %21 = vector.shape_cast %20 : vector<1x32x8xf32> to vector<32x8xf32>
    %cst_21 = arith.constant dense<0.000000e+00> : vector<32x256xf32>
    %22 = tpu.matmul %21, %19, %cst_21 {dimension_numbers = #tpu.dot_dimension_numbers<[1], [0], [0], [1], [0, 0, 1, 1], [], []>} : vector<32x8xf32>, vector<8x256xf32>, vector<32x256xf32> -> vector<32x256xf32>
    %23 = arith.addf %18, %22 : vector<32x256xf32>
    %c0_22 = arith.constant 0 : index
    %c113 = arith.constant 113 : index
    %24 = vector.load %arg10[%c0_22, %c113] : memref<8x512xf32, #tpu.memory_space<vmem>>, vector<8x256xf32>
    %25 = vector.broadcast %12 : vector<1x256xf32> to vector<8x256xf32>
    %26 = arith.mulf %24, %25 : vector<8x256xf32>
    %c2 = arith.constant 2 : index
    %c0_23 = arith.constant 0 : index
    %c0_24 = arith.constant 0 : index
    %27 = vector.load %arg4[%c2, %c0_23, %c0_24] : memref<9x32x8xf32, #tpu.memory_space<vmem>>, vector<1x32x8xf32>
    %28 = vector.shape_cast %27 : vector<1x32x8xf32> to vector<32x8xf32>
    %cst_25 = arith.constant dense<0.000000e+00> : vector<32x256xf32>
    %29 = tpu.matmul %28, %26, %cst_25 {dimension_numbers = #tpu.dot_dimension_numbers<[1], [0], [0], [1], [0, 0, 1, 1], [], []>} : vector<32x8xf32>, vector<8x256xf32>, vector<32x256xf32> -> vector<32x256xf32>
    %30 = arith.addf %23, %29 : vector<32x256xf32>
    %c0_26 = arith.constant 0 : index
    %c127 = arith.constant 127 : index
    %31 = vector.load %arg10[%c0_26, %c127] : memref<8x512xf32, #tpu.memory_space<vmem>>, vector<8x256xf32>
    %32 = vector.broadcast %11 : vector<1x256xf32> to vector<8x256xf32>
    %33 = arith.mulf %31, %32 : vector<8x256xf32>
    %c3 = arith.constant 3 : index
    %c0_27 = arith.constant 0 : index
    %c0_28 = arith.constant 0 : index
    %34 = vector.load %arg4[%c3, %c0_27, %c0_28] : memref<9x32x8xf32, #tpu.memory_space<vmem>>, vector<1x32x8xf32>
    %35 = vector.shape_cast %34 : vector<1x32x8xf32> to vector<32x8xf32>
    %cst_29 = arith.constant dense<0.000000e+00> : vector<32x256xf32>
    %36 = tpu.matmul %35, %33, %cst_29 {dimension_numbers = #tpu.dot_dimension_numbers<[1], [0], [0], [1], [0, 0, 1, 1], [], []>} : vector<32x8xf32>, vector<8x256xf32>, vector<32x256xf32> -> vector<32x256xf32>
    %37 = arith.addf %30, %36 : vector<32x256xf32>
    %c0_30 = arith.constant 0 : index
    %c128_31 = arith.constant 128 : index
    %38 = vector.load %arg10[%c0_30, %c128_31] : memref<8x512xf32, #tpu.memory_space<vmem>>, vector<8x256xf32>
    %c4 = arith.constant 4 : index
    %c0_32 = arith.constant 0 : index
    %c0_33 = arith.constant 0 : index
    %39 = vector.load %arg4[%c4, %c0_32, %c0_33] : memref<9x32x8xf32, #tpu.memory_space<vmem>>, vector<1x32x8xf32>
    %40 = vector.shape_cast %39 : vector<1x32x8xf32> to vector<32x8xf32>
    %cst_34 = arith.constant dense<0.000000e+00> : vector<32x256xf32>
    %41 = tpu.matmul %40, %38, %cst_34 {dimension_numbers = #tpu.dot_dimension_numbers<[1], [0], [0], [1], [0, 0, 1, 1], [], []>} : vector<32x8xf32>, vector<8x256xf32>, vector<32x256xf32> -> vector<32x256xf32>
    %42 = arith.addf %37, %41 : vector<32x256xf32>
    %c0_35 = arith.constant 0 : index
    %c129 = arith.constant 129 : index
    %43 = vector.load %arg10[%c0_35, %c129] : memref<8x512xf32, #tpu.memory_space<vmem>>, vector<8x256xf32>
    %44 = vector.broadcast %12 : vector<1x256xf32> to vector<8x256xf32>
    %45 = arith.mulf %43, %44 : vector<8x256xf32>
    %c5 = arith.constant 5 : index
    %c0_36 = arith.constant 0 : index
    %c0_37 = arith.constant 0 : index
    %46 = vector.load %arg4[%c5, %c0_36, %c0_37] : memref<9x32x8xf32, #tpu.memory_space<vmem>>, vector<1x32x8xf32>
    %47 = vector.shape_cast %46 : vector<1x32x8xf32> to vector<32x8xf32>
    %cst_38 = arith.constant dense<0.000000e+00> : vector<32x256xf32>
    %48 = tpu.matmul %47, %45, %cst_38 {dimension_numbers = #tpu.dot_dimension_numbers<[1], [0], [0], [1], [0, 0, 1, 1], [], []>} : vector<32x8xf32>, vector<8x256xf32>, vector<32x256xf32> -> vector<32x256xf32>
    %49 = arith.addf %42, %48 : vector<32x256xf32>
    %c0_39 = arith.constant 0 : index
    %c143 = arith.constant 143 : index
    %50 = vector.load %arg10[%c0_39, %c143] : memref<8x512xf32, #tpu.memory_space<vmem>>, vector<8x256xf32>
    %51 = vector.broadcast %11 : vector<1x256xf32> to vector<8x256xf32>
    %52 = arith.mulf %50, %51 : vector<8x256xf32>
    %c6 = arith.constant 6 : index
    %c0_40 = arith.constant 0 : index
    %c0_41 = arith.constant 0 : index
    %53 = vector.load %arg4[%c6, %c0_40, %c0_41] : memref<9x32x8xf32, #tpu.memory_space<vmem>>, vector<1x32x8xf32>
    %54 = vector.shape_cast %53 : vector<1x32x8xf32> to vector<32x8xf32>
    %cst_42 = arith.constant dense<0.000000e+00> : vector<32x256xf32>
    %55 = tpu.matmul %54, %52, %cst_42 {dimension_numbers = #tpu.dot_dimension_numbers<[1], [0], [0], [1], [0, 0, 1, 1], [], []>} : vector<32x8xf32>, vector<8x256xf32>, vector<32x256xf32> -> vector<32x256xf32>
    %56 = arith.addf %49, %55 : vector<32x256xf32>
    %c0_43 = arith.constant 0 : index
    %c144 = arith.constant 144 : index
    %57 = vector.load %arg10[%c0_43, %c144] : memref<8x512xf32, #tpu.memory_space<vmem>>, vector<8x256xf32>
    %c7 = arith.constant 7 : index
    %c0_44 = arith.constant 0 : index
    %c0_45 = arith.constant 0 : index
    %58 = vector.load %arg4[%c7, %c0_44, %c0_45] : memref<9x32x8xf32, #tpu.memory_space<vmem>>, vector<1x32x8xf32>
    %59 = vector.shape_cast %58 : vector<1x32x8xf32> to vector<32x8xf32>
    %cst_46 = arith.constant dense<0.000000e+00> : vector<32x256xf32>
    %60 = tpu.matmul %59, %57, %cst_46 {dimension_numbers = #tpu.dot_dimension_numbers<[1], [0], [0], [1], [0, 0, 1, 1], [], []>} : vector<32x8xf32>, vector<8x256xf32>, vector<32x256xf32> -> vector<32x256xf32>
    %61 = arith.addf %56, %60 : vector<32x256xf32>
    %c0_47 = arith.constant 0 : index
    %c145 = arith.constant 145 : index
    %62 = vector.load %arg10[%c0_47, %c145] : memref<8x512xf32, #tpu.memory_space<vmem>>, vector<8x256xf32>
    %63 = vector.broadcast %12 : vector<1x256xf32> to vector<8x256xf32>
    %64 = arith.mulf %62, %63 : vector<8x256xf32>
    %c8 = arith.constant 8 : index
    %c0_48 = arith.constant 0 : index
    %c0_49 = arith.constant 0 : index
    %65 = vector.load %arg4[%c8, %c0_48, %c0_49] : memref<9x32x8xf32, #tpu.memory_space<vmem>>, vector<1x32x8xf32>
    %66 = vector.shape_cast %65 : vector<1x32x8xf32> to vector<32x8xf32>
    %cst_50 = arith.constant dense<0.000000e+00> : vector<32x256xf32>
    %67 = tpu.matmul %66, %64, %cst_50 {dimension_numbers = #tpu.dot_dimension_numbers<[1], [0], [0], [1], [0, 0, 1, 1], [], []>} : vector<32x8xf32>, vector<8x256xf32>, vector<32x256xf32> -> vector<32x256xf32>
    %68 = arith.addf %61, %67 : vector<32x256xf32>
    %cst_51 = arith.constant 0.000000e+00 : f32
    %69 = vector.broadcast %cst_51 : f32 to vector<32x256xf32>
    %70 = arith.maximumf %68, %69 : vector<32x256xf32>
    %c0_52 = arith.constant 0 : index
    %c0_53 = arith.constant 0 : index
    %71 = vector.load %arg5[%c0_52, %c0_53] : memref<8x32xf32, #tpu.memory_space<vmem>>, vector<8x32xf32>
    %cst_54 = arith.constant dense<0.000000e+00> : vector<8x256xf32>
    %72 = tpu.matmul %71, %70, %cst_54 {dimension_numbers = #tpu.dot_dimension_numbers<[1], [0], [0], [1], [0, 0, 1, 1], [], []>} : vector<8x32xf32>, vector<32x256xf32>, vector<8x256xf32> -> vector<8x256xf32>
    %c0_55 = arith.constant 0 : index
    %c0_56 = arith.constant 0 : index
    %73 = vector.load %arg6[%c0_55, %c0_56] : memref<8x1xf32, #tpu.memory_space<vmem>>, vector<8x1xf32>
    %74 = vector.broadcast %73 : vector<8x1xf32> to vector<8x256xf32>
    %75 = arith.addf %72, %74 : vector<8x256xf32>
    %76 = vector.extract_strided_slice %75 {offsets = [0, 0], sizes = [4, 256], strides = [1, 1]} : vector<8x256xf32> to vector<4x256xf32>
    %77 = arith.addf %76, %1 : vector<4x256xf32>
    %c0_57 = arith.constant 0 : index
    %c0_58 = arith.constant 0 : index
    %c0_59 = arith.constant 0 : index
    %78 = vector.load %arg9[%c0_57, %c0_58, %c0_59] : memref<1x4x256xf32, #tpu.memory_space<vmem>>, vector<1x4x256xf32>
    %79 = vector.shape_cast %78 : vector<1x4x256xf32> to vector<4x256xf32>
    %80 = vector.shape_cast %77 : vector<4x256xf32> to vector<1x4x256xf32>
    tpu.vector_store %arg9[%c0_57, %c0_58, %c0_59], %80 {strides = array<i32>} : memref<1x4x256xf32, #tpu.memory_space<vmem>>, vector<1x4x256xf32>,
    return
  }
  func.func @transform_0(%arg0: i32) -> (i32, i32, i32) {
    %c0_i32 = arith.constant 0 : i32
    %c0_i32_0 = arith.constant 0 : i32
    %c0_i32_1 = arith.constant 0 : i32
    return %arg0, %c0_i32, %c0_i32_0 : i32, i32, i32
  }
  func.func @transform_1(%arg0: i32) -> (i32, i32) {
    %c0_i32 = arith.constant 0 : i32
    %c0_i32_0 = arith.constant 0 : i32
    %c0_i32_1 = arith.constant 0 : i32
    return %c0_i32, %c0_i32_0 : i32, i32
  }
  func.func @transform_2(%arg0: i32) -> (i32, i32) {
    %c0_i32 = arith.constant 0 : i32
    %c0_i32_0 = arith.constant 0 : i32
    %c0_i32_1 = arith.constant 0 : i32
    return %c0_i32, %c0_i32_0 : i32, i32
  }
  func.func @transform_3(%arg0: i32) -> (i32, i32, i32) {
    %c0_i32 = arith.constant 0 : i32
    %c0_i32_0 = arith.constant 0 : i32
    %c0_i32_1 = arith.constant 0 : i32
    %c0_i32_2 = arith.constant 0 : i32
    return %c0_i32, %c0_i32_0, %c0_i32_1 : i32, i32, i32
  }
  func.func @transform_4(%arg0: i32) -> (i32, i32) {
    %c0_i32 = arith.constant 0 : i32
    %c0_i32_0 = arith.constant 0 : i32
    %c0_i32_1 = arith.constant 0 : i32
    return %c0_i32, %c0_i32_0 : i32, i32
  }
  func.func @transform_5(%arg0: i32) -> (i32, i32) {
    %c0_i32 = arith.constant 0 : i32
    %c0_i32_0 = arith.constant 0 : i32
    %c0_i32_1 = arith.constant 0 : i32
    return %c0_i32, %c0_i32_0 : i32, i32
  }
  func.func @transform_6(%arg0: i32) -> (i32, i32) {
    %c0_i32 = arith.constant 0 : i32
    %c0_i32_0 = arith.constant 0 : i32
    %c0_i32_1 = arith.constant 0 : i32
    return %c0_i32, %c0_i32_0 : i32, i32
  }
  func.func @transform_7(%arg0: i32) -> (i32, i32) {
    %c0_i32 = arith.constant 0 : i32
    %c0_i32_0 = arith.constant 0 : i32
    %c0_i32_1 = arith.constant 0 : i32
    return %c0_i32, %c0_i32_0 : i32, i32
  }
  func.func @transform_8(%arg0: i32) -> (i32, i32, i32) {
    %c0_i32 = arith.constant 0 : i32
    %c0_i32_0 = arith.constant 0 : i32
    %c0_i32_1 = arith.constant 0 : i32
    return %arg0, %c0_i32, %c0_i32_0 : i32, i32, i32
  }
}

</mosaic_0001>

<bundles_post_ra>
// kernel: layer_lbc.2
= control target key start
LH: loop header
LB: loop body
LE: loop exit
PB: predicated region body
PF: predicated region fallthrough
CT: control target
= control target key end

     0   :  { %s303_s9 = smov 0   ;;  %s323_s0 = inlined_call_operand.vmem [shape: f32[2,4,256], index: 0, kind: input, shape index: {}]   ;;  %s324_s1 = inlined_call_operand.vmem [shape: f32[2,4,1], index: 1, kind: output, shape index: {0}]   ;;  %s325_s2 = inlined_call_operand.vmem [shape: f32[2,4,1], index: 2, kind: output, shape index: {1}]  }
   0x1 LB: > { %s259_s10 = sadd.s32 4294967295, %s286_s9   ;;  %p263_p0 = scmp.ge.s32.totalorder %s286_s9, 1  ;;  %s286_s9 = sphi %s303_s9, %s13_s9  }
   0x2   : > { %p115_p1 = scmp.lt.s32.totalorder %s286_s9, 3 }
   0x4   : > { %p116_p2 = pnand %p263_p0, %p115_p1 }
   0x5   : > { %p140_p3 = scmp.lt.s32.totalorder (!%p116_p2), %s259_s10, 1  ;;  %vm157_vm0 = vcmask (!%p116_p2), 1043456   ;;  %vm163_vm1 = vcmask (!%p116_p2), 3072  }
   0x6   : > { %119 = sbr.rel (%p116_p2) target bundleno = 169 (0xa9), region = 24 }
   0xd   : > { %s327_s10 = smov (!%p140_p3, %s259_s10), 1 }
   0xe   : > { %s270_s11 = sshll.u32 %s327_s10, 3  ;;  %s266_s15 = sshll.u32 %s327_s10, 2 }
   0xf   : > { %s144_s14 = scalar_lea.vmem %s323_s0, %s270_s11  ;;  %s148_s18 = scalar_lea.vmem %s324_s1, %s266_s15 }
  0x10   : > { %v153_v0 = vld [vmem:[%s144_s14] sm:$0xff]  ;;  %s152_s21 = scalar_lea.vmem %s325_s2, %s266_s15 }
  0x11   : > { %v155_v1 = vcombine.high %v153_v0, %v153_v0  ;;  %v158_v2 = vsel %vm157_vm0, %v153_v0, 0.0  ;;  %v165_v3 = vmul.f32 %v153_v0, %v153_v0 }
  0x13   : > { %v159_v4 = vsel %vm157_vm0, %v155_v1, 0.0  ;;  %v167_v5 = vcombine.high %v165_v3, %v165_v3  ;;  %v169_v6 = vsel %vm157_vm0, %v165_v3, 0.0 }
  0x14   : > { %v160_v7 = vadd.f32 %v159_v4, %v158_v2 }
  0x15   : > { %v170_v8 = vsel %vm157_vm0, %v167_v5, 0.0 }
  0x16   : > { %161 = vadd.xlane.f32.xlu0 %v160_v7  ;;  %v171_v9 = vadd.f32 %v170_v8, %v169_v6 }
  0x1a   : > { %172 = vadd.xlane.f32.xlu0 %v171_v9 }
  0xa3   : > { %v162_v10 = vpop.xlane.xlu0 %161 }
  0xa4   : > { %164 = vst.msk [vmem:[%s148_s18] sm:$0xf] %vm163_vm1, %v162_v10 }
  0xa7   : > { %v173_v11 = vpop.xlane.xlu0 %172 }
  0xa8   : > { %174 = vst.msk [vmem:[%s152_s21] sm:$0xf] %vm163_vm1, %v173_v11 }
  0xa9 PF: > { %s13_s9 = sadd.s32 1, %s286_s9  }
  0xaa   : > { %p10_p4 = scmp.ge.s32.totalorder %s13_s9, 4  }
  0xac   :  { %12 = sbr.rel (!%p10_p4) target bundleno = 1 (0x1), region = 66 }

// kernel: layer_lbc.3
= control target key start
LH: loop header
LB: loop body
LE: loop exit
PB: predicated region body
PF: predicated region fallthrough
CT: control target
= control target key end

     0   :  { %s1952_s27 = smov 0   ;;  %s2259_s0 = inlined_call_operand.vmem [shape: f32[2,4,256], index: 0, kind: input, shape index: {}]   ;;  %s2260_s1 = inlined_call_operand.vmem [shape: f32[4,1], index: 1, kind: input, shape index: {}]   ;;  %s2261_s2 = inlined_call_operand.vmem [shape: f32[4,1], index: 2, kind: input, shape index: {}]   ;;  %s2262_s3 = inlined_call_operand.vmem [shape: f32[9,32,8], index: 3, kind: input, shape index: {}]   ;;  %s2263_s4 = inlined_call_operand.vmem [shape: f32[8,32], index: 4, kind: input, shape index: {}]   ;;  %s2264_s5 = inlined_call_operand.vmem [shape: f32[8,1], index: 5, kind: input, shape index: {}]   ;;  %s2265_s6 = inlined_call_operand.vmem [shape: f32[1,256], index: 6, kind: input, shape index: {}]   ;;  %s2266_s7 = inlined_call_operand.vmem [shape: f32[1,256], index: 7, kind: input, shape index: {}]   ;;  %s2267_s8 = inlined_call_operand.vmem [shape: f32[2,4,256], index: 8, kind: output, shape index: {}]  }
   0x1 LB: > { %s1713_s28 = sadd.s32 4294967295, %s1894_s27   ;;  %p1717_p0 = scmp.ge.s32.totalorder %s1894_s27, 1  ;;  %s1894_s27 = sphi %s1952_s27, %s18_s27  }
   0x2   : > { %p262_p1 = scmp.lt.s32.totalorder %s1894_s27, 3 }
   0x4   : > { %p263_p2 = pnand %p1717_p0, %p262_p1 }
   0x5   : > { %v307_v0 = vld [vmem:[%s2260_s1] sm:$0xf] (!%p263_p2)  ;;  %v315_v1 = vlaneseq (!%p263_p2)  ;;  %v1896_v2 = vmov (!%p263_p2), 0   ;;  %v1897_v9 = vmov (!%p263_p2), 0.0   ;;  %s1898_s15 = smov (!%p263_p2), 1   ;;  %s1899_s16 = smov (!%p263_p2), 111  }
   0x6   : > { %266 = sbr.rel (%p263_p2) target bundleno = 779 (0x30b), region = 52  ;;  %1886 = vset.pattern.permute.xlu0 (!%p263_p2), %v1896_v2  ;;  %v321_v4 = vld [vmem:[%s2261_s2] sm:$0xf] (!%p263_p2)  ;;  %336 = vst [vmem:[#allocation2 + $0x8] sm:$0xff] (!%p263_p2), %v1897_v9  ;;  %337 = vst [vmem:[#allocation2 + $0x10] sm:$0xff] (!%p263_p2), %v1897_v9  ;;  %980 = vmatprep.mubr.f32.mxu0 (!%p263_p2), %v1897_v9  ;;  %s1900_s17 = smov (!%p263_p2), 15  }
   0x7   : > { %310 = vperm.xlu0 (!%p263_p2), %1886, %v307_v0   ;;  %v316_v3 = vshrl.u32 (!%p263_p2), %v315_v1, 7  ;;  %v345_v5 = vld [vmem:[%s2266_s7] sm:$0x3] (!%p263_p2)  ;;  %470 = vmatprep.mubr.f32.mxu1 (!%p263_p2), %v1897_v9  ;;  %s1901_s18 = smov (!%p263_p2), 113   ;;  %s1902_s19 = smov (!%p263_p2), 127   ;;  %vm785_vm0 = vcmask (!%p263_p2), 7168  }
   0x8   : > { %v344_v8 = vld [vmem:[%s2265_s6] sm:$0x3] (!%p263_p2)  ;;  %s1903_s20 = smov (!%p263_p2), 17   ;;  %p296_p3 = scmp.lt.s32.totalorder (!%p263_p2), %s1713_s28, 1  ;;  %v1904_v14 = vmov (!%p263_p2), 839922192  }
   0x9   : > { %v352_v6 = vsub.s32 (!%p263_p2), 0, %v316_v3  ;;  %v356_v7 = vsub.s32 (!%p263_p2), 1, %v316_v3  ;;  %v313_v15 = vunpack.c.l.s4 (!%p263_p2), %v1904_v14  ;;  %s1905_s25 = smov (!%p263_p2), 16   ;;  %vm393_vm1 = vcmask (!%p263_p2), 64512   ;;  %v1750_v33 = vld [vmem:[%s2262_s3 + $0x80] sm:$0xff] (!%p263_p2)  ;;  %v1751_v39 = vld [vmem:[%s2262_s3 + $0x88] sm:$0xff] (!%p263_p2) }
   0xa   : > { %vm362_vm2 = vcmask (!%p263_p2), 908288   ;;  %vm645_vm3 = vcmask (!%p263_p2), 121856   ;;  %v1752_v41 = vld [vmem:[%s2262_s3 + $0x90] sm:$0xff] (!%p263_p2)  ;;  %v1753_v46 = vld [vmem:[%s2262_s3 + $0x98] sm:$0xff] (!%p263_p2)  ;;  %vm623_vm4 = vcmask (!%p263_p2), 924672   ;;  %s1906_s14 = smov (!%p263_p2), 112  }
   0xb   : > { %324 = vperm.xlu0 (!%p263_p2), %1886, %v321_v4   ;;  %v614_v10 = vrot.slane (!%p263_p2), %v345_v5, %v352_v6  ;;  %v353_v11 = vrot.slane (!%p263_p2), %v344_v8, %v352_v6  ;;  %v618_v12 = vrot.slane (!%p263_p2), %v345_v5, %v356_v7  ;;  %v357_v13 = vrot.slane (!%p263_p2), %v344_v8, %v356_v7  ;;  %v1567_v4 = vld [vmem:[%s2264_s5] sm:$0xff] (!%p263_p2) }
   0xc   : > { %v314_v17 = vunpack.c.0.s8 (!%p263_p2), %v313_v15  ;;  %vm763_vm5 = vcmask (!%p263_p2), 1039360   ;;  %vm504_vm6 = vcmask (!%p263_p2), 138240   ;;  %vm388_vm7 = vcmask (!%p263_p2), 130048  }
   0xd   : > { %1016 = vrot.lane.b32.xlu1 %v614_v10, %s1898_s15  ;;  %s2269_s28 = smov (!%p296_p3, %s1713_s28), 1  ;;  %vm1306_vm8 = vcmask 916480   ;;  %vm1573_vm9 = vcmask 261120  }
   0xe   : > { %s1793_s21 = sshll.u32 %s2269_s28, 3  ;;  %v317_v18 = vsub.s32 %v314_v17, %v316_v3 }
   0xf   : > { %358 = vrot.lane.b32.xlu0 %v353_v11, %s1899_s16  ;;  %s300_s24 = scalar_lea.vmem %s2259_s0, %s1793_s21  ;;  %s305_s9 = scalar_lea.vmem %s2267_s8, %s1793_s21 }
  0x10   : > { %v2001_v23 = vld [vmem:[%s300_s24] sm:$0xff] }
  0x11   : > { %1018 = vrot.lane.b32.xlu1 %v618_v12, %s1898_s15 }
  0x13   : > { %1154 = vrot.lane.b32.xlu0 %v353_v11, %s1900_s17 }
  0x15   : > { %360 = vrot.lane.b32.xlu1 %v357_v13, %s1899_s16 }
  0x17   : > { %619 = vrot.lane.b32.xlu0 %v614_v10, %s1901_s18 }
  0x19   : > { %1156 = vrot.lane.b32.xlu1 %v357_v13, %s1900_s17 }
  0x1b   : > { %759 = vrot.lane.b32.xlu0 %v353_v11, %s1902_s19 }
  0x1d   : > { %621 = vrot.lane.b32.xlu1 %v618_v12, %s1901_s18 }
  0x1f   : > { %1420 = vrot.lane.b32.xlu0 %v614_v10, %s1903_s20 }
  0x21   : > { %761 = vrot.lane.b32.xlu1 %v357_v13, %s1902_s19  ;;  %v1758_v13 = vld [vmem:[%s2262_s3 + $0xa0] sm:$0xff] }
  0x25   : > { %1422 = vrot.lane.b32.xlu1 %v618_v12, %s1903_s20 }
  0x7f   : > { %v1017_v16 = vpop.permute.xlu1 %1016 }
  0x83   : > { %v1019_v19 = vpop.permute.xlu1 %1018 }
  0x84   : > { %v1026_v20 = vmul.f32 0.0, %v1019_v19  ;;  %v1020_v32 = vsel %vm785_vm0, %v1017_v16, %v1019_v19  ;;  %v1759_v19 = vld [vmem:[%s2262_s3 + $0xa8] sm:$0xff] }
  0x86   : > { %v311_v21 = vpop.permute.xlu0 %310  ;;  %1039 = vrot.lane.b32.xlu1 %v1026_v20, %s1902_s19 }
  0x87   : > { %v318_v22 = vrot.slane %v311_v21, %v317_v18  ;;  %v361_v29 = vpop.permute.xlu1 %360  ;;  %v1723_v21 = vld [vmem:[%s2262_s3 + $0x28] sm:$0xff] }
  0x89   : > { %v320_v25 = vmul.f32 %v318_v22, %v2001_v23 }
  0x8a   : > { %v325_v24 = vpop.permute.xlu0 %324 }
  0x8b   : > { %v332_v26 = vrot.slane %v325_v24, %v317_v18  ;;  %v1157_v37 = vpop.permute.xlu1 %1156  ;;  %v1760_v24 = vld [vmem:[%s2262_s3 + $0xb0] sm:$0xff] }
  0x8c   : > { %v1164_v38 = vmul.f32 0.0, %v1157_v37 }
  0x8d   : > { %v334_v27 = vadd.f32 %v332_v26, %v320_v25 }
  0x8e   : > { %v359_v36 = vpop.permute.xlu0 %358 }
  0x8f   : > { %v340_v28 = vcombine.high %v334_v27, %v334_v27  ;;  %342 = vst [vmem:[#allocation2 + $0x8] sm:$0xf] %v334_v27  ;;  %v363_v40 = vsel %vm362_vm2, %v359_v36, %v361_v29  ;;  %v367_v50 = vmul.f32 0.0, %v359_v36  ;;  %v622_v51 = vpop.permute.xlu1 %621  ;;  %v1724_v27 = vld [vmem:[%s2262_s3 + $0x30] sm:$0xff]  ;;  %v1766_v36 = vld [vmem:[%s2262_s3 + $0xc0] sm:$0xff] }
  0x91   : > { %343 = vst [vmem:[#allocation2 + $0x10] sm:$0xf] %v340_v28 }
  0x92   : > { %v1155_v43 = vpop.permute.xlu0 %1154 }
  0x93   : > { %v1158_v45 = vsel %vm645_vm3, %v1155_v43, %v1157_v37  ;;  %v762_v55 = vpop.permute.xlu1 %761 }
  0x96   : > { %v2004_v30 = vld [vmem:[#allocation2 + $0x8] sm:$0xff]  ;;  %v620_v49 = vpop.permute.xlu0 %619 }
  0x97   : > { %384 = vrot.lane.b32.xlu0 %v2004_v30, %s1905_s25  ;;  %v1024_v35 = vmul.f32 %v1017_v16, %v2004_v30  ;;  %v368_v42 = vmul.f32 %v363_v40, %v2004_v30  ;;  %v1162_v48 = vmul.f32 %v1155_v43, %v2004_v30  ;;  %v624_v52 = vsel %vm623_vm4, %v620_v49, %v622_v51  ;;  %v1423_v58 = vpop.permute.xlu1 %1422  ;;  %v1722_v16 = vld [vmem:[%s2262_s3 + $0x20] sm:$0xff]  ;;  %v1767_v40 = vld [vmem:[%s2262_s3 + $0xc8] sm:$0xff] }
  0x98   : > { %v2007_v31 = vld [vmem:[#allocation2 + $0x10] sm:$0xff]  ;;  %v629_v53 = vmul.f32 %v624_v52, %v2004_v30  ;;  %v628_v57 = vmul.f32 0.0, %v620_v49  ;;  %v1430_v59 = vmul.f32 0.0, %v1423_v58  ;;  %v371_v43 = vld [vmem:[%s2262_s3 + $0x8] sm:$0xff]  ;;  %v1769_v52 = vld [vmem:[%s2262_s3 + $0xd8] sm:$0xff] }
  0x99   : > { %386 = vrot.lane.b32.xlu1 %v2007_v31, %s1905_s25  ;;  %916 = vmatprep.subr.mxu0 %v2007_v31  ;;  %v1025_v34 = vmul.f32 %v1020_v32, %v2007_v31  ;;  %v369_v44 = vmul.f32 %v361_v29, %v2007_v31  ;;  %v1163_v47 = vmul.f32 %v1158_v45, %v2007_v31  ;;  %v372_v49 = vld [vmem:[%s2262_s3 + $0x10] sm:$0xff] }
  0x9a   : > { %917 = vmatpush1.msra.mxu0 %v2004_v30  ;;  %v630_v54 = vmul.f32 %v622_v51, %v2007_v31  ;;  %v760_v56 = vpop.permute.xlu0 %759  ;;  %v770_v63 = vmul.f32 %v762_v55, %v2007_v31 }
  0x9b   : > { %1037 = vrot.lane.b32.xlu0 %v1025_v34, %s1902_s19  ;;  %1754 = vmatmul.mubr.msk.f32.vlgmr.msra.gmra.mrb[0].mxu0 %vm393_vm1, %v1750_v33  ;;  %v764_v60 = vsel %vm763_vm5, %v760_v56, %v762_v55  ;;  %v768_v3 = vmul.f32 0.0, %v760_v56  ;;  %v1725_v33 = vld [vmem:[%s2262_s3 + $0x38] sm:$0xff]  ;;  %v1774_v56 = vld [vmem:[%s2262_s3 + $0xe0] sm:$0xff] }
  0x9c   : > { %986 = vmatprep.mubr.f32.mxu0 %v1897_v9  ;;  %v769_v62 = vmul.f32 %v764_v60, %v2004_v30 }
  0x9d   : > { %1035 = vrot.lane.b32.xlu1 %v1024_v35, %s1902_s19 }
  0x9e   : > { %v1421_v61 = vpop.permute.xlu0 %1420 }
  0x9f   : > { %382 = vrot.lane.b32.xlu0 %v1897_v9, %s1905_s25  ;;  %1755 = vmatmul.mubr.msk.f32.gmra.mrb[2].mxu0 %vm393_vm1, %v1751_v39  ;;  %v1424_v0 = vsel %vm504_vm6, %v1421_v61, %v1423_v58  ;;  %v1428_v2 = vmul.f32 %v1421_v61, %v2004_v30 }
  0xa0   : > { %992 = vmatprep.mubr.f32.mxu0 %v1897_v9  ;;  %v1429_v1 = vmul.f32 %v1424_v0, %v2007_v31 }
  0xa1   : > { %1177 = vrot.lane.b32.xlu1 %v1164_v38, %s1901_s18  ;;  %v370_v38 = vld [vmem:[%s2262_s3] sm:$0xff] }
  0xa3   : > { %500 = vrot.lane.b32.xlu0 %v368_v42, %s1903_s20  ;;  %1756 = vmatmul.mubr.msk.f32.gmra.mrb[4].mxu0 %vm393_vm1, %v1752_v41 }
  0xa4   : > { %998 = vmatprep.mubr.f32.mxu0 %v1897_v9 }
  0xa5   : > { %502 = vrot.lane.b32.xlu1 %v369_v44, %s1903_s20 }
  0xa7   : > { %1175 = vrot.lane.b32.xlu0 %v1163_v47, %s1901_s18  ;;  %1757 = vmatmul.mubr.msk.f32.gmra.mrb[6].mxu0 %vm393_vm1, %v1753_v46  ;;  %v1768_v46 = vld [vmem:[%s2262_s3 + $0xd0] sm:$0xff] }
  0xa8   : > { %1121 = vmatprep.mubr.f32.mxu0 %v1897_v9 }
  0xa9   : > { %1173 = vrot.lane.b32.xlu1 %v1162_v48, %s1901_s18 }
  0xab   : > { %498 = vrot.lane.b32.xlu0 %v367_v50, %s1903_s20 }
  0xad   : > { %1304 = vrot.lane.b32.xlu1 %v1897_v9, %s1906_s14 }
  0xaf   : > { %641 = vrot.lane.b32.xlu0 %v629_v53, %s1900_s17 }
  0xb1   : > { %643 = vrot.lane.b32.xlu1 %v630_v54, %s1900_s17  ;;  %v373_v54 = vld [vmem:[%s2262_s3 + $0x18] sm:$0xff] }
  0xb3   : > { %1302 = vrot.lane.b32.xlu0 %v2007_v31, %s1906_s14 }
  0xb5   : > { %1300 = vrot.lane.b32.xlu1 %v2004_v30, %s1906_s14  ;;  %v1761_v30 = vld [vmem:[%s2262_s3 + $0xb8] sm:$0xff] }
  0xb7   : > { %639 = vrot.lane.b32.xlu0 %v628_v57, %s1900_s17 }
  0xb9   : > { %1443 = vrot.lane.b32.xlu1 %v1430_v59, %s1899_s16  ;;  %v1734_v59 = vld [vmem:[%s2262_s3 + $0x40] sm:$0xff] }
  0xbb   : > { %781 = vrot.lane.b32.xlu0 %v769_v62, %s1898_s15  ;;  %v1775_v62 = vld [vmem:[%s2262_s3 + $0xe8] sm:$0xff] }
  0xbd   : > { %783 = vrot.lane.b32.xlu1 %v770_v63, %s1898_s15 }
  0xbf   : > { %1441 = vrot.lane.b32.xlu0 %v1429_v1, %s1899_s16  ;;  %v1735_v1 = vld [vmem:[%s2262_s3 + $0x48] sm:$0xff] }
  0xc1   : > { %1439 = vrot.lane.b32.xlu1 %v1428_v2, %s1899_s16 }
  0xc3   : > { %779 = vrot.lane.b32.xlu0 %v768_v3, %s1898_s15  ;;  %v1776_v3 = vld [vmem:[%s2262_s3 + $0xf0] sm:$0xff] }
  0xc7   : > { %1570 = vperm.xlu0 %1886, %v1567_v4   ;;  %v1736_v4 = vld [vmem:[%s2262_s3 + $0x50] sm:$0xff] }
  0xf8   : > { %v1040_v5 = vpop.permute.xlu1 %1039 }
 0x109   : > { %v385_v6 = vpop.permute.xlu0 %384 }
 0x10b   : > { %v387_v7 = vpop.permute.xlu1 %386 }
 0x10c   : > { %v390_v8 = vsel %vm388_vm7, %v385_v6, %v387_v7  ;;  %v1782_v7 = vld [vmem:[%s2262_s3 + $0x100] sm:$0xff] }
 0x10d   : > { %406 = vmatprep.subr.mxu1 %v390_v8  ;;  %v1038_v10 = vpop.permute.xlu0 %1037  ;;  %v1742_v8 = vld [vmem:[%s2262_s3 + $0x60] sm:$0xff] }
 0x10e   : > { %v1042_v12 = vsel %vm763_vm5, %v1038_v10, %v1040_v5  ;;  %v1777_v5 = vld [vmem:[%s2262_s3 + $0xf8] sm:$0xff] }
 0x10f   : > { %v1036_v11 = vpop.permute.xlu1 %1035  ;;  %1057 = vmatprep.subr.mxu0 %v1042_v12  ;;  %v1784_v12 = vld [vmem:[%s2262_s3 + $0x110] sm:$0xff] }
 0x110   : > { %v1041_v14 = vsel %vm763_vm5, %v1036_v11, %v1038_v10  ;;  %v1783_v10 = vld [vmem:[%s2262_s3 + $0x108] sm:$0xff] }
 0x111   : > { %1058 = vmatpush1.msra.mxu0 %v1041_v14  ;;  %v383_v15 = vpop.permute.xlu0 %382  ;;  %v1743_v11 = vld [vmem:[%s2262_s3 + $0x68] sm:$0xff]  ;;  %v1785_v14 = vld [vmem:[%s2262_s3 + $0x118] sm:$0xff] }
 0x112   : > { %1762 = vmatmul.mubr.msk.f32.vlgmr.msra.gmra.mrb[0].mxu0 %vm393_vm1, %v1758_v13  ;;  %v389_v17 = vsel %vm388_vm7, %v383_v15, %v385_v6  ;;  %v1737_v6 = vld [vmem:[%s2262_s3 + $0x58] sm:$0xff]  ;;  %v1744_v13 = vld [vmem:[%s2262_s3 + $0x70] sm:$0xff] }
 0x113   : > { %v1178_v18 = vpop.permute.xlu1 %1177  ;;  %1127 = vmatprep.mubr.f32.mxu0 %v1897_v9  ;;  %407 = vmatpush1.msra.mxu1 %v389_v17  ;;  %v1745_v15 = vld [vmem:[%s2262_s3 + $0x78] sm:$0xff] }
 0x114   : > { %1726 = vmatmul.mubr.msk.f32.vlgmr.msra.gmra.mrb[0].mxu1 %vm393_vm1, %v1722_v16 }
 0x115   : > { %v501_v20 = vpop.permute.xlu0 %500  ;;  %476 = vmatprep.mubr.f32.mxu1 %v1897_v9 }
 0x116   : > { %1763 = vmatmul.mubr.msk.f32.gmra.mrb[2].mxu0 %vm393_vm1, %v1759_v19 }
 0x117   : > { %v503_v22 = vpop.permute.xlu1 %502  ;;  %1133 = vmatprep.mubr.f32.mxu0 %v1897_v9 }
 0x118   : > { %v506_v25 = vsel %vm504_vm6, %v501_v20, %v503_v22  ;;  %1727 = vmatmul.mubr.msk.f32.gmra.mrb[2].mxu1 %vm393_vm1, %v1723_v21 }
 0x119   : > { %521 = vmatprep.subr.mxu1 %v506_v25  ;;  %v1176_v26 = vpop.permute.xlu0 %1175  ;;  %482 = vmatprep.mubr.f32.mxu1 %v1897_v9 }
 0x11a   : > { %1764 = vmatmul.mubr.msk.f32.gmra.mrb[4].mxu0 %vm393_vm1, %v1760_v24  ;;  %v1180_v28 = vsel %vm623_vm4, %v1176_v26, %v1178_v18 }
 0x11b   : > { %v1174_v29 = vpop.permute.xlu1 %1173  ;;  %1139 = vmatprep.mubr.f32.mxu0 %v1897_v9  ;;  %1195 = vmatprep.subr.mxu0 %v1180_v28 }
 0x11c   : > { %v1179_v31 = vsel %vm623_vm4, %v1174_v29, %v1176_v26  ;;  %1728 = vmatmul.mubr.msk.f32.gmra.mrb[4].mxu1 %vm393_vm1, %v1724_v27 }
 0x11d   : > { %1196 = vmatpush1.msra.mxu0 %v1179_v31  ;;  %v499_v32 = vpop.permute.xlu0 %498  ;;  %488 = vmatprep.mubr.f32.mxu1 %v1897_v9 }
 0x11e   : > { %1765 = vmatmul.mubr.msk.f32.gmra.mrb[6].mxu0 %vm393_vm1, %v1761_v30  ;;  %v505_v34 = vsel %vm504_vm6, %v499_v32, %v501_v20 }
 0x11f   : > { %v1305_v35 = vpop.permute.xlu1 %1304  ;;  %1259 = vmatprep.mubr.f32.mxu0 %v1897_v9  ;;  %522 = vmatpush1.msra.mxu1 %v505_v34 }
 0x120   : > { %1729 = vmatmul.mubr.msk.f32.gmra.mrb[6].mxu1 %vm393_vm1, %v1725_v33 }
 0x121   : > { %v642_v37 = vpop.permute.xlu0 %641  ;;  %585 = vmatprep.mubr.f32.mxu1 %v1897_v9 }
 0x122   : > { %1770 = vmatmul.mubr.msk.f32.vlgmr.msra.gmra.mrb[0].mxu0 %vm393_vm1, %v1766_v36 }
 0x123   : > { %v644_v39 = vpop.permute.xlu1 %643  ;;  %1265 = vmatprep.mubr.f32.mxu0 %v1897_v9 }
 0x124   : > { %v647_v41 = vsel %vm645_vm3, %v642_v37, %v644_v39  ;;  %1730 = vmatmul.mubr.msk.f32.vlgmr.msra.gmra.mrb[0].mxu1 %vm393_vm1, %v370_v38 }
 0x125   : > { %662 = vmatprep.subr.mxu1 %v647_v41  ;;  %v1303_v42 = vpop.permute.xlu0 %1302  ;;  %591 = vmatprep.mubr.f32.mxu1 %v1897_v9 }
 0x126   : > { %1771 = vmatmul.mubr.msk.f32.gmra.mrb[2].mxu0 %vm393_vm1, %v1767_v40  ;;  %v1308_v44 = vsel %vm1306_vm8, %v1303_v42, %v1305_v35 }
 0x127   : > { %v1301_v45 = vpop.permute.xlu1 %1300  ;;  %1271 = vmatprep.mubr.f32.mxu0 %v1897_v9  ;;  %1323 = vmatprep.subr.mxu0 %v1308_v44 }
 0x128   : > { %v1307_v47 = vsel %vm1306_vm8, %v1301_v45, %v1303_v42  ;;  %1731 = vmatmul.mubr.msk.f32.gmra.mrb[2].mxu1 %vm393_vm1, %v371_v43 }
 0x129   : > { %1324 = vmatpush1.msra.mxu0 %v1307_v47  ;;  %v640_v48 = vpop.permute.xlu0 %639  ;;  %597 = vmatprep.mubr.f32.mxu1 %v1897_v9 }
 0x12a   : > { %1772 = vmatmul.mubr.msk.f32.gmra.mrb[4].mxu0 %vm393_vm1, %v1768_v46  ;;  %v646_v50 = vsel %vm645_vm3, %v640_v48, %v642_v37 }
 0x12b   : > { %v1444_v51 = vpop.permute.xlu1 %1443  ;;  %1277 = vmatprep.mubr.f32.mxu0 %v1897_v9  ;;  %663 = vmatpush1.msra.mxu1 %v646_v50 }
 0x12c   : > { %1732 = vmatmul.mubr.msk.f32.gmra.mrb[4].mxu1 %vm393_vm1, %v372_v49 }
 0x12d   : > { %v782_v53 = vpop.permute.xlu0 %781  ;;  %603 = vmatprep.mubr.f32.mxu1 %v1897_v9 }
 0x12e   : > { %1773 = vmatmul.mubr.msk.f32.gmra.mrb[6].mxu0 %vm393_vm1, %v1769_v52  ;;  %v1566_v52 = vld [vmem:[%s2263_s4] sm:$0xff] }
 0x12f   : > { %v784_v55 = vpop.permute.xlu1 %783  ;;  %1387 = vmatprep.mubr.f32.mxu0 %v1897_v9 }
 0x130   : > { %v787_v57 = vsel %vm785_vm0, %v782_v53, %v784_v55  ;;  %1733 = vmatmul.mubr.msk.f32.gmra.mrb[6].mxu1 %vm393_vm1, %v373_v54  ;;  %v1649_v55 = vcombine.high %v2001_v23, %v2001_v23 }
 0x131   : > { %802 = vmatprep.subr.mxu1 %v787_v57  ;;  %v1442_v58 = vpop.permute.xlu0 %1441  ;;  %726 = vmatprep.mubr.f32.mxu1 %v1897_v9 }
 0x132   : > { %1778 = vmatmul.mubr.msk.f32.vlgmr.msra.gmra.mrb[0].mxu0 %vm393_vm1, %v1774_v56  ;;  %v1446_v60 = vsel %vm362_vm2, %v1442_v58, %v1444_v51 }
 0x133   : > { %v1440_v61 = vpop.permute.xlu1 %1439  ;;  %1393 = vmatprep.mubr.f32.mxu0 %v1897_v9  ;;  %1461 = vmatprep.subr.mxu0 %v1446_v60 }
 0x134   : > { %v1445_v63 = vsel %vm362_vm2, %v1440_v61, %v1442_v58  ;;  %1738 = vmatmul.mubr.msk.f32.vlgmr.msra.gmra.mrb[0].mxu1 %vm393_vm1, %v1734_v59 }
 0x135   : > { %1462 = vmatpush1.msra.mxu0 %v1445_v63  ;;  %v780_v0 = vpop.permute.xlu0 %779  ;;  %732 = vmatprep.mubr.f32.mxu1 %v1897_v9 }
 0x136   : > { %1779 = vmatmul.mubr.msk.f32.gmra.mrb[2].mxu0 %vm393_vm1, %v1775_v62  ;;  %v786_v2 = vsel %vm785_vm0, %v780_v0, %v782_v53 }
 0x137   : > { %1399 = vmatprep.mubr.f32.mxu0 %v1897_v9  ;;  %803 = vmatpush1.msra.mxu1 %v786_v2 }
 0x138   : > { %1739 = vmatmul.mubr.msk.f32.gmra.mrb[2].mxu1 %vm393_vm1, %v1735_v1 }
 0x139   : > { %738 = vmatprep.mubr.f32.mxu1 %v1897_v9 }
 0x13a   : > { %1780 = vmatmul.mubr.msk.f32.gmra.mrb[4].mxu0 %vm393_vm1, %v1776_v3 }
 0x13b   : > { %1405 = vmatprep.mubr.f32.mxu0 %v1897_v9 }
 0x13c   : > { %1740 = vmatmul.mubr.msk.f32.gmra.mrb[4].mxu1 %vm393_vm1, %v1736_v4 }
 0x13d   : > { %744 = vmatprep.mubr.f32.mxu1 %v1897_v9 }
 0x13e   : > { %1781 = vmatmul.mubr.msk.f32.gmra.mrb[6].mxu0 %vm393_vm1, %v1777_v5 }
 0x13f   : > { %1525 = vmatprep.mubr.f32.mxu0 %v1897_v9 }
 0x140   : > { %1741 = vmatmul.mubr.msk.f32.gmra.mrb[6].mxu1 %vm393_vm1, %v1737_v6 }
 0x141   : > { %866 = vmatprep.mubr.f32.mxu1 %v1897_v9 }
 0x142   : > { %1786 = vmatmul.mubr.msk.f32.vlgmr.msra.gmra.mrb[0].mxu0 %vm393_vm1, %v1782_v7 }
 0x143   : > { %1531 = vmatprep.mubr.f32.mxu0 %v1897_v9 }
 0x144   : > { %1746 = vmatmul.mubr.msk.f32.vlgmr.msra.gmra.mrb[0].mxu1 %vm393_vm1, %v1742_v8 }
 0x145   : > { %872 = vmatprep.mubr.f32.mxu1 %v1897_v9 }
 0x146   : > { %1787 = vmatmul.mubr.msk.f32.gmra.mrb[2].mxu0 %vm393_vm1, %v1783_v10  ;;  %v1571_v53 = vpop.permute.xlu0 %1570 }
 0x147   : > { %1537 = vmatprep.mubr.f32.mxu0 %v1897_v9 }
 0x148   : > { %1747 = vmatmul.mubr.msk.f32.gmra.mrb[2].mxu1 %vm393_vm1, %v1743_v11 }
 0x149   : > { %878 = vmatprep.mubr.f32.mxu1 %v1897_v9 }
 0x14a   : > { %1788 = vmatmul.mubr.msk.f32.gmra.mrb[4].mxu0 %vm393_vm1, %v1784_v12 }
 0x14b   : > { %1543 = vmatprep.mubr.f32.mxu0 %v1897_v9 }
 0x14c   : > { %1748 = vmatmul.mubr.msk.f32.gmra.mrb[4].mxu1 %vm393_vm1, %v1744_v13 }
 0x14d   : > { %884 = vmatprep.mubr.f32.mxu1 %v1897_v9 }
 0x14e   : > { %1789 = vmatmul.mubr.msk.f32.gmra.mrb[6].mxu0 %vm393_vm1, %v1785_v14 }
 0x150   : > { %1749 = vmatmul.mubr.msk.f32.gmra.mrb[6].mxu1 %vm393_vm1, %v1745_v15 }
 0x151   : > { %1641 = vmatprep.mubr.f32.mxu1 %v1897_v9 }
 0x215   : > { %v1527_v16 = vpop.f32.mrb[0].mxu0 }
 0x216   : > { %v1529_v17 = vpop.f32.mrb[1].mxu0 }
 0x217   : > { %v868_v18 = vpop.f32.mrb[0].mxu1 }
 0x218   : > { %v1803_v19 = vadd.f32 %v1527_v16, %v868_v18  ;;  %v870_v20 = vpop.f32.mrb[1].mxu1 }
 0x219   : > { %v1533_v21 = vpop.f32.mrb[2].mxu0  ;;  %v1804_v22 = vadd.f32 %v1529_v17, %v870_v20 }
 0x21a   : > { %v1535_v24 = vpop.f32.mrb[3].mxu0  ;;  %v1558_v31 = vmax.f32 %v1803_v19, 0.0 }
 0x21b   : > { %v874_v25 = vpop.f32.mrb[2].mxu1  ;;  %v1559_v33 = vmax.f32 %v1804_v22, 0.0 }
 0x21c   : > { %v1805_v26 = vadd.f32 %v1533_v21, %v874_v25  ;;  %v876_v27 = vpop.f32.mrb[3].mxu1 }
 0x21d   : > { %v1539_v28 = vpop.f32.mrb[4].mxu0  ;;  %v1806_v29 = vadd.f32 %v1535_v24, %v876_v27 }
 0x21e   : > { %v1541_v30 = vpop.f32.mrb[5].mxu0  ;;  %v1560_v32 = vmax.f32 %v1805_v26, 0.0 }
 0x21f   : > { %v1561_v34 = vmax.f32 %v1806_v29, 0.0  ;;  %v880_v35 = vpop.f32.mrb[4].mxu1 }
 0x220   : > { %v1797_v9 = vpack.c.bf16 %v1560_v32, %v1558_v31  ;;  %v1807_v36 = vadd.f32 %v1539_v28, %v880_v35  ;;  %v882_v37 = vpop.f32.mrb[5].mxu1 }
 0x221   : > { %v1545_v38 = vpop.f32.mrb[6].mxu0  ;;  %v1795_v39 = vpack.c.bf16 %v1561_v34, %v1559_v33  ;;  %v1808_v40 = vadd.f32 %v1541_v30, %v882_v37 }
 0x222   : > { %v1547_v41 = vpop.f32.mrb[7].mxu0  ;;  %v1562_v46 = vmax.f32 %v1807_v36, 0.0 }
 0x223   : > { %v886_v42 = vpop.f32.mrb[6].mxu1  ;;  %1796 = vmatprep.subr.bf16.mxu1 %v1795_v39  ;;  %v1563_v48 = vmax.f32 %v1808_v40, 0.0 }
 0x224   : > { %v1809_v43 = vadd.f32 %v1545_v38, %v886_v42  ;;  %v888_v44 = vpop.f32.mrb[7].mxu1  ;;  %1798 = vmatpush1.bf16.msra.mxu1 %v1797_v9 }
 0x225   : > { %v1810_v45 = vadd.f32 %v1547_v41, %v888_v44 }
 0x226   : > { %v1564_v47 = vmax.f32 %v1809_v43, 0.0 }
 0x227   : > { %v1565_v49 = vmax.f32 %v1810_v45, 0.0 }
 0x228   : > { %v1801_v50 = vpack.c.bf16 %v1564_v47, %v1562_v46 }
 0x229   : > { %v1799_v51 = vpack.c.bf16 %v1565_v49, %v1563_v48 }
 0x22b   : > { %1800 = vmatprep.subr.bf16.mxu1 %v1799_v51 }
 0x22c   : > { %1802 = vmatpush1.bf16.msra.mxu1 %v1801_v50 }
 0x22f   : > { %1790 = vmatmul.mubr.msk.f32.vlgmr.msra.gmra.mrb[8].mxu1 %vm1573_vm9, %v1566_v52 }
 0x302   : > { %v1643_v54 = vpop.f32.mrb[8].mxu1 }
 0x303   : > { %v1644_v56 = vadd.f32 %v1643_v54, %v1571_v53  ;;  %v1645_v57 = vpop.f32.mrb[9].mxu1 }
 0x304   : > { %v1646_v58 = vadd.f32 %v1645_v57, %v1571_v53 }
 0x305   : > { %v1651_v59 = vadd.f32 %v1644_v56, %v2001_v23 }
 0x306   : > { %v1652_v60 = vadd.f32 %v1649_v55, %v1646_v58 }
 0x308   : > { %v1655_v61 = vcombine.low %v1651_v59, %v1652_v60 }
 0x30a   : > { %1657 = vst [vmem:[%s305_s9] sm:$0xff] %v1655_v61 }
 0x30b PF: > { %s18_s27 = sadd.s32 1, %s1894_s27  }
 0x30c   : > { %p15_p4 = scmp.ge.s32.totalorder %s18_s27, 4  }
 0x30e   :  { %17 = sbr.rel (!%p15_p4) target bundleno = 1 (0x1), region = 90 }

</bundles_post_ra>
